<compile_context>
chip_gen: v6e
topology: v6e:2x2x1
jax: 0.10.0
libtpu: 0.0.40
codegen_flags: <defaults>
</compile_context>

<pallas_src>
import math

import jax
import jax.numpy as jnp
from jax.experimental import pallas as pl
from jax.experimental.pallas import tpu as pltpu


def dqn_kernel(x_ref, w1_ref, b1_ref, w2_ref, b2_ref, w3_ref, b3_ref, o_ref):
    # layer1 + ReLU  (bf16 MXU operands, f32 accumulate, f32 VPU bias/ReLU)
    h1 = jnp.dot(x_ref[...].astype(jnp.bfloat16), w1_ref[...],
                 preferred_element_type=jnp.float32)
    h1 = jnp.maximum(h1 + b1_ref[...], 0.0)
    # layer2 + ReLU
    h2 = jnp.dot(h1.astype(jnp.bfloat16), w2_ref[...],
                 preferred_element_type=jnp.float32)
    h2 = jnp.maximum(h2 + b2_ref[...], 0.0)
    # layer3 (no activation) — written into a lane-dense 128-wide slab
    out = jnp.dot(h2.astype(jnp.bfloat16), w3_ref[...],
                  preferred_element_type=jnp.float32) + b3_ref[...]
    o_ref[...] = out.astype(o_ref.dtype)


def dqn_forward(x, params, n_actions, tile_b=128):
    """x: (batch, n_observations) f32. Returns (batch, n_actions) f32."""
    w1, b1, w2, b2, w3, b3 = params
    batch, n_obs = x.shape
    k_pad = w1.shape[0]      # padded contraction dim of layer1 (128)
    hidden = w1.shape[1]     # 128
    n_pad = w3.shape[1]      # padded output dim (128)

    # Pad batch to a multiple of tile_b and features to the padded contraction width.
    b_pad = tile_b * pl.cdiv(batch, tile_b)
    x_p = jnp.zeros((b_pad, k_pad), jnp.float32).at[:batch, :n_obs].set(x)

    const_map = lambda i: (0, 0)   # weights/biases stay resident across the batch grid
    out = pl.pallas_call(
        dqn_kernel,
        out_shape=jax.ShapeDtypeStruct((b_pad, n_pad), jnp.float32),
        grid=(b_pad // tile_b,),
        in_specs=[
            pl.BlockSpec((tile_b, k_pad), lambda i: (i, 0)),   # x tile (pipelined)
            pl.BlockSpec((k_pad, hidden), const_map),          # w1
            pl.BlockSpec((1, hidden), const_map),              # b1
            pl.BlockSpec((hidden, hidden), const_map),         # w2
            pl.BlockSpec((1, hidden), const_map),              # b2
            pl.BlockSpec((hidden, n_pad), const_map),          # w3
            pl.BlockSpec((1, n_pad), const_map),               # b3
        ],
        out_specs=pl.BlockSpec((tile_b, n_pad), lambda i: (i, 0)),
        compiler_params=pltpu.CompilerParams(
            dimension_semantics=("parallel",)),                # v7x: shard batch over 2 TCs
    )(x_p, w1, b1, w2, b2, w3, b3)

    return out[:batch, :n_actions]


def init_params(key, n_observations, n_actions, hidden=128, k_pad=128, n_pad=128):
    """nn.Linear-style init (uniform(-1/sqrt(fan_in), +1/sqrt(fan_in))), stored as
    [in, out], zero-padded to lane-dense shapes, weights cast to bf16."""
    ks = jax.random.split(key, 6)

    def linear(kw, kb, fan_in, fan_out, pad_in, pad_out):
        bound = 1.0 / math.sqrt(fan_in)
        w = jax.random.uniform(kw, (fan_in, fan_out), jnp.float32, -bound, bound)
        b = jax.random.uniform(kb, (1, fan_out), jnp.float32, -bound, bound)
        w_p = jnp.zeros((pad_in, pad_out), jnp.float32).at[:fan_in, :fan_out].set(w)
        b_p = jnp.zeros((1, pad_out), jnp.float32).at[:, :fan_out].set(b)
        return w_p.astype(jnp.bfloat16), b_p  # weights bf16, biases f32

    w1, b1 = linear(ks[0], ks[1], n_observations, hidden, k_pad, hidden)
    w2, b2 = linear(ks[2], ks[3], hidden, hidden, hidden, hidden)
    w3, b3 = linear(ks[4], ks[5], hidden, n_actions, hidden, n_pad)
    return w1, b1, w2, b2, w3, b3


def dqn_reference(x, params, n_actions):
    """Plain-XLA reference doing the exact same padded / bf16-operand math."""
    w1, b1, w2, b2, w3, b3 = params
    k_pad = w1.shape[0]
    xb = jnp.zeros((x.shape[0], k_pad), jnp.float32).at[:, :x.shape[1]].set(x)
    h1 = jnp.maximum(
        jnp.dot(xb.astype(jnp.bfloat16), w1, preferred_element_type=jnp.float32) + b1, 0.0)
    h2 = jnp.maximum(
        jnp.dot(h1.astype(jnp.bfloat16), w2, preferred_element_type=jnp.float32) + b2, 0.0)
    out = jnp.dot(h2.astype(jnp.bfloat16), w3, preferred_element_type=jnp.float32) + b3
    return out[:, :n_actions]


if __name__ == "__main__":
    # Pendulum-v0: n_observations = 3, n_actions = 1
    n_observations, n_actions = 3, 1
    batch = 200  # non-multiple of the 128-row tile exercises batch padding + 2 grid steps

    key = jax.random.PRNGKey(0)
    kx, kp = jax.random.split(key)
    x = jax.random.normal(kx, (batch, n_observations), dtype=jnp.float32)
    params = init_params(kp, n_observations, n_actions)

    out = dqn_forward(x, params, n_actions)
    out = jax.block_until_ready(out)

    ref = dqn_reference(x, params, n_actions)
    assert out.shape == (batch, n_actions)
    assert jnp.allclose(out, ref, atol=1e-3, rtol=1e-3), "mismatch vs JAX reference"

    print("KERNEL_OK")
</pallas_src>

<mosaic_0001>
module attributes {stable_mosaic.version = 11 : i64} {
  func.func @dqn_kernel(%arg0: i32, %arg1: memref<128x128xf32, #tpu.memory_space<vmem>>, %arg2: memref<128x128xbf16, #tpu.memory_space<vmem>>, %arg3: memref<1x128xf32, #tpu.memory_space<vmem>>, %arg4: memref<128x128xbf16, #tpu.memory_space<vmem>>, %arg5: memref<1x128xf32, #tpu.memory_space<vmem>>, %arg6: memref<128x128xbf16, #tpu.memory_space<vmem>>, %arg7: memref<1x128xf32, #tpu.memory_space<vmem>>, %arg8: memref<128x128xf32, #tpu.memory_space<vmem>>) attributes {dimension_semantics = [#tpu.dimension_semantics<parallel>], iteration_bounds = array<i64: 2>, scalar_prefetch = 0 : i64, scratch_operands = 0 : i64, tpu.core_type = #tpu.core_type<tc>, window_params = [{transform_indices = @transform_0, window_bounds = array<i64: 128, 128>}, {pipeline_mode = #tpu.pipeline_mode<synchronous>, transform_indices = @transform_1, window_bounds = array<i64: 128, 128>}, {pipeline_mode = #tpu.pipeline_mode<synchronous>, transform_indices = @transform_2, window_bounds = array<i64: 1, 128>}, {pipeline_mode = #tpu.pipeline_mode<synchronous>, transform_indices = @transform_3, window_bounds = array<i64: 128, 128>}, {pipeline_mode = #tpu.pipeline_mode<synchronous>, transform_indices = @transform_4, window_bounds = array<i64: 1, 128>}, {pipeline_mode = #tpu.pipeline_mode<synchronous>, transform_indices = @transform_5, window_bounds = array<i64: 128, 128>}, {pipeline_mode = #tpu.pipeline_mode<synchronous>, transform_indices = @transform_6, window_bounds = array<i64: 1, 128>}, {transform_indices = @transform_7, window_bounds = array<i64: 128, 128>}]} {
    %c0 = arith.constant 0 : index
    %c0_0 = arith.constant 0 : index
    %0 = vector.load %arg1[%c0, %c0_0] : memref<128x128xf32, #tpu.memory_space<vmem>>, vector<128x128xf32>
    %1 = arith.truncf %0 : vector<128x128xf32> to vector<128x128xbf16>
    %c0_1 = arith.constant 0 : index
    %c0_2 = arith.constant 0 : index
    %2 = vector.load %arg2[%c0_1, %c0_2] : memref<128x128xbf16, #tpu.memory_space<vmem>>, vector<128x128xbf16>
    %cst = arith.constant dense<0.000000e+00> : vector<128x128xf32>
    %3 = tpu.matmul %1, %2, %cst {dimension_numbers = #tpu.dot_dimension_numbers<[1], [0], [0], [1], [0, 0, 1, 1], [], []>} : vector<128x128xbf16>, vector<128x128xbf16>, vector<128x128xf32> -> vector<128x128xf32>
    %c0_3 = arith.constant 0 : index
    %c0_4 = arith.constant 0 : index
    %4 = vector.load %arg3[%c0_3, %c0_4] : memref<1x128xf32, #tpu.memory_space<vmem>>, vector<1x128xf32>
    %5 = vector.broadcast %4 : vector<1x128xf32> to vector<128x128xf32>
    %6 = arith.addf %3, %5 : vector<128x128xf32>
    %cst_5 = arith.constant 0.000000e+00 : f32
    %7 = vector.broadcast %cst_5 : f32 to vector<128x128xf32>
    %8 = arith.maximumf %6, %7 : vector<128x128xf32>
    %9 = arith.truncf %8 : vector<128x128xf32> to vector<128x128xbf16>
    %c0_6 = arith.constant 0 : index
    %c0_7 = arith.constant 0 : index
    %10 = vector.load %arg4[%c0_6, %c0_7] : memref<128x128xbf16, #tpu.memory_space<vmem>>, vector<128x128xbf16>
    %cst_8 = arith.constant dense<0.000000e+00> : vector<128x128xf32>
    %11 = tpu.matmul %9, %10, %cst_8 {dimension_numbers = #tpu.dot_dimension_numbers<[1], [0], [0], [1], [0, 0, 1, 1], [], []>} : vector<128x128xbf16>, vector<128x128xbf16>, vector<128x128xf32> -> vector<128x128xf32>
    %c0_9 = arith.constant 0 : index
    %c0_10 = arith.constant 0 : index
    %12 = vector.load %arg5[%c0_9, %c0_10] : memref<1x128xf32, #tpu.memory_space<vmem>>, vector<1x128xf32>
    %13 = vector.broadcast %12 : vector<1x128xf32> to vector<128x128xf32>
    %14 = arith.addf %11, %13 : vector<128x128xf32>
    %cst_11 = arith.constant 0.000000e+00 : f32
    %15 = vector.broadcast %cst_11 : f32 to vector<128x128xf32>
    %16 = arith.maximumf %14, %15 : vector<128x128xf32>
    %17 = arith.truncf %16 : vector<128x128xf32> to vector<128x128xbf16>
    %c0_12 = arith.constant 0 : index
    %c0_13 = arith.constant 0 : index
    %18 = vector.load %arg6[%c0_12, %c0_13] : memref<128x128xbf16, #tpu.memory_space<vmem>>, vector<128x128xbf16>
    %cst_14 = arith.constant dense<0.000000e+00> : vector<128x128xf32>
    %19 = tpu.matmul %17, %18, %cst_14 {dimension_numbers = #tpu.dot_dimension_numbers<[1], [0], [0], [1], [0, 0, 1, 1], [], []>} : vector<128x128xbf16>, vector<128x128xbf16>, vector<128x128xf32> -> vector<128x128xf32>
    %c0_15 = arith.constant 0 : index
    %c0_16 = arith.constant 0 : index
    %20 = vector.load %arg7[%c0_15, %c0_16] : memref<1x128xf32, #tpu.memory_space<vmem>>, vector<1x128xf32>
    %21 = vector.broadcast %20 : vector<1x128xf32> to vector<128x128xf32>
    %22 = arith.addf %19, %21 : vector<128x128xf32>
    %c0_17 = arith.constant 0 : index
    %c0_18 = arith.constant 0 : index
    %23 = vector.load %arg8[%c0_17, %c0_18] : memref<128x128xf32, #tpu.memory_space<vmem>>, vector<128x128xf32>
    tpu.vector_store %arg8[%c0_17, %c0_18], %22 {strides = array<i32>} : memref<128x128xf32, #tpu.memory_space<vmem>>, vector<128x128xf32>,
    return
  }
  func.func @transform_0(%arg0: i32) -> (i32, i32) {
    %c0_i32 = arith.constant 0 : i32
    %c0_i32_0 = arith.constant 0 : i32
    return %arg0, %c0_i32 : i32, i32
  }
  func.func @transform_1(%arg0: i32) -> (i32, i32) {
    %c0_i32 = arith.constant 0 : i32
    %c0_i32_0 = arith.constant 0 : i32
    %c0_i32_1 = arith.constant 0 : i32
    return %c0_i32, %c0_i32_0 : i32, i32
  }
  func.func @transform_2(%arg0: i32) -> (i32, i32) {
    %c0_i32 = arith.constant 0 : i32
    %c0_i32_0 = arith.constant 0 : i32
    %c0_i32_1 = arith.constant 0 : i32
    return %c0_i32, %c0_i32_0 : i32, i32
  }
  func.func @transform_3(%arg0: i32) -> (i32, i32) {
    %c0_i32 = arith.constant 0 : i32
    %c0_i32_0 = arith.constant 0 : i32
    %c0_i32_1 = arith.constant 0 : i32
    return %c0_i32, %c0_i32_0 : i32, i32
  }
  func.func @transform_4(%arg0: i32) -> (i32, i32) {
    %c0_i32 = arith.constant 0 : i32
    %c0_i32_0 = arith.constant 0 : i32
    %c0_i32_1 = arith.constant 0 : i32
    return %c0_i32, %c0_i32_0 : i32, i32
  }
  func.func @transform_5(%arg0: i32) -> (i32, i32) {
    %c0_i32 = arith.constant 0 : i32
    %c0_i32_0 = arith.constant 0 : i32
    %c0_i32_1 = arith.constant 0 : i32
    return %c0_i32, %c0_i32_0 : i32, i32
  }
  func.func @transform_6(%arg0: i32) -> (i32, i32) {
    %c0_i32 = arith.constant 0 : i32
    %c0_i32_0 = arith.constant 0 : i32
    %c0_i32_1 = arith.constant 0 : i32
    return %c0_i32, %c0_i32_0 : i32, i32
  }
  func.func @transform_7(%arg0: i32) -> (i32, i32) {
    %c0_i32 = arith.constant 0 : i32
    %c0_i32_0 = arith.constant 0 : i32
    return %arg0, %c0_i32 : i32, i32
  }
}

</mosaic_0001>

<bundles_post_ra>
// kernel: tpu_custom_call.1
= control target key start
LH: loop header
LB: loop body
LE: loop exit
PB: predicated region body
PF: predicated region fallthrough
CT: control target
= control target key end

     0   :  { %s1855_s0 = inlined_call_operand.hbm [shape: f32[256,128], index: 0, kind: input, shape index: {}]   ;;  %s1856_s1 = inlined_call_operand.hbm [shape: bf16[128,128], index: 1, kind: input, shape index: {}]   ;;  %s1857_s2 = inlined_call_operand.vmem [shape: f32[1,128], index: 2, kind: input, shape index: {}]   ;;  %s1858_s3 = inlined_call_operand.hbm [shape: bf16[128,128], index: 3, kind: input, shape index: {}]   ;;  %s1859_s4 = inlined_call_operand.vmem [shape: f32[1,128], index: 4, kind: input, shape index: {}]   ;;  %s1860_s5 = inlined_call_operand.hbm [shape: bf16[128,128], index: 5, kind: input, shape index: {}]   ;;  %s1861_s6 = inlined_call_operand.vmem [shape: f32[1,128], index: 6, kind: input, shape index: {}]   ;;  %s1862_s7 = inlined_call_operand.hbm [shape: f32[256,128], index: 7, kind: output, shape index: {}]  }
   0x1   :  { %1867 = sst [smem:[#allocation15_spill]] %s1856_s1 }
   0x2   :  { %12 = vsyncpa [#allocation3], 0 }
   0x3   :  { %14 = vsyncpa [#allocation3 + $0x1], 0 }
   0x4   :  { %15 = vsyncpa [#allocation6], 0 }
   0x5   :  { %16 = vsyncpa [#allocation9], 0 }
   0x6   :  { %17 = vsyncpa [#allocation4], 0 }
   0x7   :  { %19 = vsyncpa [#allocation4 + $0x1], 0  ;;  %s1599_s24 = smov 0   ;;  %s1601_s25 = smov 0  }
   0x8   :  { %s1603_s26 = smov 0   ;;  %s1605_s27 = smov 0  }
   0x9 LB: > { %s1620_s28 = sadd.s32 4294967295, %s1546_s27   ;;  %s1052_s29 = sadd.s32 4294967294, %s1546_s27   ;;  %s1546_s27 = sphi %s1605_s27, %s1888_s27   ;;  %s1542_s26 = sphi %s1603_s26, %s1887_s26   ;;  %s1538_s25 = sphi %s1601_s25, %s1886_s25   ;;  %s1534_s24 = sphi %s1599_s24, %s1885_s24  }
   0xa   : > { %p45_p0 = scmp.ne.s32.totalorder %s1538_s25, %s1534_s24  ;;  %p1863_p1 = scmp.eq.s32.totalorder %s1620_s28, 0 }
   0xb   : > { %p201_p3 = scmp.eq.s32.totalorder %s1052_s29, 1  ;;  %p1053_p5 = scmp.ge.s32.totalorder %s1546_s27, 1 }
   0xc   : > { %p1629_p4 = por %p1863_p1, %p45_p0  ;;  %p208_p7 = scmp.lt.s32.totalorder %s1546_s27, 3 }
   0xd   : > { %p1634_p6 = por %p201_p3, %p45_p0  ;;  %s1548_s10 = smov [#allocation5]  }
   0xe   : > { %s1868_s30 = scalar_select %p1629_p4, 1, 0 }
   0xf   : > { %s1869_s8 = scalar_select %p1634_p6, 1, 0 }
  0x10   : > { %p1639_p8 = pnand %p1053_p5, %p208_p7  ;;  %s220_s11 = sshll.u32 %s1548_s10, 4  ;;  %s221_s11 = int_to_ptr.vmem [resolvable:$true] %s220_s11 }
  0x11   : > { %s1549_s13 = smov [#allocation7]   ;;  %s1550_s15 = smov [#allocation8]  }
  0x12   : > { %s1870_s9 = scalar_select %p1639_p8, 1, 0 }
  0x13   : > { %p1277_p9 = pneg %p1639_p8  ;;  %s236_s14 = sshll.u32 %s1549_s13, 4  ;;  %s237_s14 = int_to_ptr.vmem [resolvable:$true] %s236_s14 }
  0x14   : > { %s252_s16 = sshll.u32 %s1550_s15, 4  ;;  %s1379_s17 = scalar_lea.vmem %s221_s11, 1024  ;;  %s253_s16 = int_to_ptr.vmem [resolvable:$true] %s252_s16 }
  0x15   : > { %p1648_p11 = pnand %p1277_p9, %p1863_p1  ;;  %p1380_p13 = scmp.ne.s32.totalorder %s221_s11, %s1379_s17 }
  0x16   : > { %p1387_p5 = scmp.lt.s32.totalorder %s221_s11, %s221_s11  ;;  %p1388_p7 = scmp.lt.s32.totalorder %s1379_s17, %s1379_s17 }
  0x17   : > { %p1370_p12 = pneg %p1648_p11 }
  0x18   : > { %p1389_p9 = por %p1388_p7, %p1387_p5 }
  0x19   : > { %p1382_p0 = pnand %p1380_p13, %p1370_p12 }
  0x1b   : > { %p1383_p3 = pneg %p1382_p0 }
  0x1d   : > { %p1390_p10 = pnand %p1389_p9, %p1383_p3 }
  0x1f   : > { %1393 = shalt.err (!%p1390_p10)
}
  0x20   : > { %s1551_s18 = smov 64   ;;  %s1552_s19 = smov 4  }
  0x21   : > { %s1872_s1 = sld [smem:[#allocation15_spill]]  ;;  %s1405_s22 = scalar_lea.vmem %s237_s14, 1024 }
  0x22   : > { %p1406_p1 = scmp.ne.s32.totalorder %s237_s14, %s1405_s22  ;;  %p1413_p2 = scmp.lt.s32.totalorder %s237_s14, %s237_s14 }
  0x23   : > { %p1414_p6 = scmp.lt.s32.totalorder %s1405_s22, %s1405_s22 }
  0x24   : > { %p1408_p13 = pnand %p1406_p1, %p1370_p12 }
  0x25   : > { %p1415_p5 = por %p1414_p6, %p1413_p2 }
  0x26   : > { %p1409_p0 = pneg %p1408_p13 }
  0x27   : > { %1280 = dma.hbm_to_vmem [thread:$0]  (!%p1648_p11), %s1872_s1, 1024, %s221_s11, [#allocation6], %s1551_s18, %s1551_s18, %s1552_s19  }
  0x28   : > { %p1416_p3 = pnand %p1415_p5, %p1409_p0 }
  0x2a   : > { %1419 = shalt.err (!%p1416_p3)
}
  0x2b   : > { %1283 = dma.hbm_to_vmem [thread:$0]  (!%p1648_p11), %s1858_s3, 1024, %s237_s14, [#allocation6], %s1551_s18, %s1551_s18, %s1552_s19  }
  0x2c   : > { %s1431_s10 = scalar_lea.vmem %s253_s16, 1024  ;;  %p1439_p9 = scmp.lt.s32.totalorder %s253_s16, %s253_s16 }
  0x2d   : > { %p1432_p10 = scmp.ne.s32.totalorder %s253_s16, %s1431_s10  ;;  %p1440_p13 = scmp.lt.s32.totalorder %s1431_s10, %s1431_s10 }
  0x2f   : > { %p1434_p7 = pnand %p1432_p10, %p1370_p12  ;;  %p1441_p4 = por %p1440_p13, %p1439_p9 }
  0x31   : > { %p1435_p1 = pneg %p1434_p7 }
  0x33   : > { %p1442_p2 = pnand %p1441_p4, %p1435_p1 }
  0x35   : > { %1445 = shalt.err (!%p1442_p2)
}
  0x36   : > { %1286 = dma.hbm_to_vmem [thread:$0]  (!%p1648_p11), %s1860_s5, 1024, %s253_s16, [#allocation9], %s1551_s18, %s1551_s18, %s1552_s19  }
  0x37   : > { %s1679_s14 = sadd.s32 1, %s1546_s27   ;;  %s32_s12 = sadd.s32 1, %s1542_s26 }
  0x38   : > { %s29_s15 = ssub.s32 %s1546_s27, %s1679_s14  ;;  %p39_p6 = scmp.ne.s32.totalorder %s1542_s26, %s1538_s25 }
  0x39   : > { %p30_p4 = scmp.eq.s32.totalorder %s29_s15, 0  ;;  %p40_p12 = scmp.eq.s32.totalorder %s1546_s27, 0 }
  0x3a   : > { %p1298_p0 = scmp.lt.s32.totalorder %s1546_s27, 2  ;;  %p1873_p3 = scmp.eq.s32.totalorder %s1620_s28, 1 }
  0x3b   : > { %s1689_s17 = scalar_select %p30_p4, %s1542_s26, %s32_s12  }
  0x3c   : > { %p41_p5 = por %p40_p12, %p39_p6  ;;  %p1693_p10 = por %p1873_p3, %p39_p6 }
  0x3d   : > { %s269_s21 = sand.u32 1, %s1542_s26   ;;  %s1099_s22 = sshll.u32 %s1546_s27, 11 }
  0x3e   : > { %s1874_s20 = scalar_select %p1693_p10, 1, 0 }
  0x3f   : > { %s1058_s16 = sshll.u32 %s269_s21, 7  ;;  %s1702_s23 = scalar_lea.hbm %s1855_s0, %s1099_s22 }
  0x40   : > { %s273_s29 = scalar_lea.vmem [#allocation2], %s1058_s16  ;;  %p1704_p11 = pnand %p1298_p0, %p41_p5 }
  0x41   : > { %s280_s10 = sshll.u32 %s273_s29, 4  ;;  %s1710_s13 = scalar_lea.sflag [#allocation3], %s269_s21  ;;  %s1708_s10 = int_to_ptr.vmem [resolvable:$true] %s280_s10 }
  0x42   : > { %s1446_s15 = scalar_lea.hbm %s1702_s23, 2048  ;;  %p1448_p1 = pneg %p1704_p11 }
  0x43   : > { %p1447_p7 = scmp.ne.s32.totalorder %s1702_s23, %s1446_s15  ;;  %s1451_s16 = scalar_lea.hbm %s1855_s0, 4096 }
  0x44   : > { %p1452_p2 = scmp.lt.s32.totalorder %s1702_s23, %s1855_s0  ;;  %p1453_p4 = scmp.lt.s32.totalorder %s1451_s16, %s1446_s15 }
  0x45   : > { %p1449_p9 = pnand %p1448_p1, %p1447_p7 }
  0x46   : > { %p1454_p6 = por %p1453_p4, %p1452_p2 }
  0x47   : > { %p1450_p13 = pneg %p1449_p9 }
  0x49   : > { %p1455_p12 = pnand %p1454_p6, %p1450_p13 }
  0x4b   : > { %1458 = shalt.err (!%p1455_p12)
}
  0x4c   : > { %s1459_s21 = scalar_lea.vmem %s1708_s10, 2048  ;;  %s1553_s29 = smov [#allocation2]  }
  0x4d   : > { %p1460_p0 = scmp.ne.s32.totalorder %s1708_s10, %s1459_s21  ;;  %s1464_s1 = sshll.u32 %s1553_s29, 4  ;;  %s1465_s1 = int_to_ptr.vmem [resolvable:$false] %s1464_s1 }
  0x4e   : > { %s1466_s12 = scalar_lea.vmem %s1465_s1, 4096  ;;  %p1467_p7 = scmp.lt.s32.totalorder %s1708_s10, %s1465_s1 }
  0x4f   : > { %p1462_p5 = pnand %p1460_p0, %p1448_p1  ;;  %p1468_p9 = scmp.lt.s32.totalorder %s1466_s12, %s1459_s21 }
  0x51   : > { %p1463_p3 = pneg %p1462_p5  ;;  %p1469_p10 = por %p1468_p9, %p1467_p7 }
  0x53   : > { %p1470_p8 = pnand %p1469_p10, %p1463_p3 }
  0x55   : > { %1473 = shalt.err (!%p1470_p8)
}
  0x56   : > { %s1554_s15 = smov 128   ;;  %s1555_s22 = smov 8  }
  0x57   : > { %1290 = dma.hbm_to_vmem [thread:$0]  (!%p1704_p11), %s1702_s23, 2048, %s1708_s10, %s1710_s13, %s1554_s15, %s1554_s15, %s1555_s22  }
  0x58   : > { %p1876_p1 = scmp.ne.s32.totalorder %s1870_s9, 0 }
  0x59   : > { %s1734_s16 = sand.u32 (!%p1876_p1), 1, %s1538_s25   ;;  %p1877_p8 = scmp.ne.s32.totalorder (!%p1876_p1), %s1868_s30, 0 }
  0x5a   : > { %292 = sbr.rel (%p1876_p1) target bundleno = 786 (0x312), region = 48  ;;  %s1062_s1 = sshll.u32 (!%p1876_p1), %s1734_s16, 7 }
  0x5b   : > { %s295_s18 = scalar_lea.sflag (!%p1876_p1), [#allocation3], %s1734_s16  ;;  %s1740_s19 = scalar_lea.vmem (!%p1876_p1), [#allocation2], %s1062_s1 }
  0x5f   : > { %1517 = dma.done.wait (%p1877_p8), %s295_s18, 2048  }
  0x60   : > { %1519 = vsyncadd (%p1877_p8), %s295_s18, 4294965248  ;;  %p1878_p10 = scmp.eq.s32.totalorder %s1620_s28, 0 }
  0x62   : > { %1521 = dma.done.wait (%p1878_p10), [#allocation6], 2048   ;;  %p1879_p11 = pmov %p1878_p10 }
  0x63   : > { %p1880_p13 = pmov %p1878_p10 }
  0x64   : > { %1523 = vsyncadd (%p1879_p11), [#allocation6], 4294965248 }
  0x65   : > { %1525 = dma.done.wait (%p1880_p13), [#allocation9], 1024   ;;  %p1881_p2 = pmov %p1878_p10 }
  0x66   : > { %v1344_v0 = vld [vmem:[#allocation5 + $0x38] sm:$0xff]   ;;  %v1345_v1 = vld [vmem:[#allocation5 + $0x30] sm:$0xff]   ;;  %v1346_v2 = vld [vmem:[#allocation5 + $0x28] sm:$0xff]   ;;  %s1787_s21 = scalar_lea.vmem [#allocation10], %s1062_s1  ;;  %s1100_s29 = sshll.u32 %s1620_s28, 11 }
  0x67   : > { %1527 = vsyncadd (%p1881_p2), [#allocation9], 4294966272  ;;  %1149 = vmatprep.subr.bf16.mxu0 %v1344_v0  ;;  %v1347_v3 = vld [vmem:[#allocation5 + $0x20] sm:$0xff]   ;;  %v345_v5 = vld [vmem:[%s1740_s19 + $0x8] sm:$0xff]  ;;  %s950_s12 = sshll.u32 %s1787_s21, 4  ;;  %s1808_s1 = scalar_lea.hbm %s1862_s7, %s1100_s29  ;;  %s1810_s12 = int_to_ptr.vmem [resolvable:$true] %s950_s12 }
  0x68   : > { %1150 = vmatpush3.bf16.msra.mxu0 %v1344_v0  ;;  %v344_v4 = vld [vmem:[%s1740_s19] sm:$0xff]  ;;  %v1348_v7 = vld [vmem:[#allocation5 + $0x18] sm:$0xff]   ;;  %v1353_v9 = vld [vmem:[#allocation7 + $0x30] sm:$0xff]   ;;  %s937_s18 = scalar_lea.sflag [#allocation4], %s1734_s16  ;;  %s1474_s28 = scalar_lea.vmem %s1810_s12, 2048 }
  0x69   : > { %1151 = vmatprep.subr.bf16.mxu0 %v1345_v1  ;;  %v360_v6 = vpack.c.bf16 %v345_v5, %v344_v4  ;;  %v1352_v8 = vld [vmem:[#allocation7 + $0x38] sm:$0xff]   ;;  %v1349_v10 = vld [vmem:[#allocation5 + $0x10] sm:$0xff]   ;;  %v1350_v11 = vld [vmem:[#allocation5 + $0x8] sm:$0xff]   ;;  %p1475_p4 = scmp.ne.s32.totalorder %s1810_s12, %s1474_s28  ;;  %p1882_p6 = scmp.ne.s32.totalorder %s1874_s20, 0 }
  0x6a   : > { %1181 = vmatprep.subr.bf16.mxu1 %v1352_v8  ;;  %v1354_v12 = vld [vmem:[#allocation7 + $0x28] sm:$0xff]   ;;  %v1355_v13 = vld [vmem:[#allocation7 + $0x20] sm:$0xff]   ;;  %v1356_v15 = vld [vmem:[#allocation7 + $0x18] sm:$0xff]  }
  0x6b   : > { %1165 = vmatprep.mubr.bf16.mxu0 %v360_v6  ;;  %1182 = vmatpush3.bf16.msra.mxu1 %v1352_v8  ;;  %v1351_v14 = vld [vmem:[#allocation5] sm:$0xff]   ;;  %v346_v16 = vld [vmem:[%s1740_s19 + $0x10] sm:$0xff]  ;;  %v347_v17 = vld [vmem:[%s1740_s19 + $0x18] sm:$0xff]  ;;  %p1476_p12 = pnand %p1475_p4, %p1882_p6 }
  0x6c   : > { %1152 = vmatpush3.bf16.msra.mxu0 %v1345_v1  ;;  %1183 = vmatprep.subr.bf16.mxu1 %v1353_v9  ;;  %v348_v18 = vld [vmem:[%s1740_s19 + $0x20] sm:$0xff]  ;;  %v349_v19 = vld [vmem:[%s1740_s19 + $0x28] sm:$0xff]  ;;  %v361_v20 = vpack.c.bf16 %v347_v17, %v346_v16  ;;  %v350_v22 = vld [vmem:[%s1740_s19 + $0x30] sm:$0xff] }
  0x6d   : > { %1153 = vmatprep.subr.bf16.mxu0 %v1346_v2  ;;  %v362_v21 = vpack.c.bf16 %v349_v19, %v348_v18  ;;  %v351_v23 = vld [vmem:[%s1740_s19 + $0x38] sm:$0xff]  ;;  %v352_v24 = vld [vmem:[%s1740_s19 + $0x40] sm:$0xff]  ;;  %v353_v25 = vld [vmem:[%s1740_s19 + $0x48] sm:$0xff]  ;;  %p1477_p0 = pneg %p1476_p12 }
  0x6e   : > { %v363_v26 = vpack.c.bf16 %v351_v23, %v350_v22  ;;  %v364_v27 = vpack.c.bf16 %v353_v25, %v352_v24  ;;  %v354_v28 = vld [vmem:[%s1740_s19 + $0x50] sm:$0xff]  ;;  %v355_v29 = vld [vmem:[%s1740_s19 + $0x58] sm:$0xff]  ;;  %v356_v30 = vld [vmem:[%s1740_s19 + $0x60] sm:$0xff] }
  0x6f   : > { %1184 = vmatpush3.bf16.msra.mxu1 %v1353_v9  ;;  %v357_v31 = vld [vmem:[%s1740_s19 + $0x68] sm:$0xff]  ;;  %v365_v32 = vpack.c.bf16 %v355_v29, %v354_v28  ;;  %v358_v34 = vld [vmem:[%s1740_s19 + $0x70] sm:$0xff]  ;;  %v359_v35 = vld [vmem:[%s1740_s19 + $0x78] sm:$0xff]  ;;  %s1556_s19 = smov [#allocation10]  }
  0x70   : > { %1154 = vmatpush3.bf16.msra.mxu0 %v1346_v2  ;;  %1185 = vmatprep.subr.bf16.mxu1 %v1354_v12  ;;  %v366_v33 = vpack.c.bf16 %v357_v31, %v356_v30  ;;  %v367_v36 = vpack.c.bf16 %v359_v35, %v358_v34  ;;  %v1357_v37 = vld [vmem:[#allocation7 + $0x10] sm:$0xff]   ;;  %v1358_v38 = vld [vmem:[#allocation7 + $0x8] sm:$0xff]   ;;  %v1359_v39 = vld [vmem:[#allocation7] sm:$0xff]   ;;  %s1478_s30 = sshll.u32 %s1556_s19, 4  ;;  %s1479_s30 = int_to_ptr.vmem [resolvable:$false] %s1478_s30 }
  0x71   : > { %1155 = vmatprep.subr.bf16.mxu0 %v1347_v3  ;;  %v1360_v40 = vld [vmem:[#allocation8 + $0x38] sm:$0xff]   ;;  %v1361_v41 = vld [vmem:[#allocation8 + $0x30] sm:$0xff]   ;;  %v1362_v42 = vld [vmem:[#allocation8 + $0x28] sm:$0xff]   ;;  %s1480_s9 = scalar_lea.vmem %s1479_s30, 4096  ;;  %p1481_p5 = scmp.lt.s32.totalorder %s1810_s12, %s1479_s30 }
  0x72   : > { %v1363_v43 = vld [vmem:[#allocation8 + $0x20] sm:$0xff]   ;;  %v1770_v44 = vld [vmem:[#allocation8 + $0x18] sm:$0xff]   ;;  %p1482_p3 = scmp.lt.s32.totalorder %s1480_s9, %s1474_s28 }
  0x73   : > { %1186 = vmatpush3.bf16.msra.mxu1 %v1354_v12  ;;  %v1067_v47 = vld [vmem:[%s1857_s2] ss:$0 sm:$0xff] }
  0x74   : > { %1156 = vmatpush3.bf16.msra.mxu0 %v1347_v3  ;;  %1187 = vmatprep.subr.bf16.mxu1 %v1355_v13  ;;  %p1483_p7 = por %p1482_p3, %p1481_p5 }
  0x75   : > { %1157 = vmatprep.subr.bf16.mxu0 %v1348_v7 }
  0x76   : > { %p1484_p9 = pnand %p1483_p7, %p1477_p0 }
  0x77   : > { %1188 = vmatpush3.bf16.msra.mxu1 %v1355_v13 }
  0x78   : > { %1158 = vmatpush3.bf16.msra.mxu0 %v1348_v7  ;;  %1189 = vmatprep.subr.bf16.mxu1 %v1356_v15 }
  0x79   : > { %1159 = vmatprep.subr.bf16.mxu0 %v1349_v10 }
  0x7b   : > { %1190 = vmatpush3.bf16.msra.mxu1 %v1356_v15 }
  0x7c   : > { %1160 = vmatpush3.bf16.msra.mxu0 %v1349_v10  ;;  %1191 = vmatprep.subr.bf16.mxu1 %v1357_v37 }
  0x7d   : > { %1161 = vmatprep.subr.bf16.mxu0 %v1350_v11 }
  0x7f   : > { %1192 = vmatpush3.bf16.msra.mxu1 %v1357_v37 }
  0x80   : > { %1162 = vmatpush3.bf16.msra.mxu0 %v1350_v11  ;;  %1193 = vmatprep.subr.bf16.mxu1 %v1358_v38 }
  0x81   : > { %1163 = vmatprep.subr.bf16.mxu0 %v1351_v14 }
  0x83   : > { %1194 = vmatpush3.bf16.msra.mxu1 %v1358_v38  ;;  %v1365_v38 = vld [vmem:[#allocation8 + $0x10] sm:$0xff]  }
  0x84   : > { %1164 = vmatpush3.bf16.msra.mxu0 %v1351_v14  ;;  %1195 = vmatprep.subr.bf16.mxu1 %v1359_v39 }
  0x85   : > { %1213 = vmatprep.subr.bf16.mxu0 %v1360_v40 }
  0x87   : > { %1166 = vmatmul.mubr.bf16.vlgmr.msra.gmra.mxu0 %v361_v20  ;;  %1196 = vmatpush3.bf16.msra.mxu1 %v1359_v39  ;;  %v1366_v39 = vld [vmem:[#allocation8 + $0x8] sm:$0xff]  }
  0x88   : > { %1169 = vmatprep.mubr.bf16.mxu0 %v362_v21  ;;  %1245 = vmatprep.subr.bf16.mxu1 %v1360_v40 }
  0x89   : > { %1214 = vmatpush3.bf16.msra.mxu0 %v1360_v40 }
  0x8a   : > { %1215 = vmatprep.subr.bf16.mxu0 %v1361_v41 }
  0x8d   : > { %1216 = vmatpush3.bf16.msra.mxu0 %v1361_v41 }
  0x8e   : > { %1217 = vmatprep.subr.bf16.mxu0 %v1362_v42 }
  0x8f   : > { %1170 = vmatmul.mubr.bf16.gmra.mxu0 %v363_v26 }
  0x90   : > { %1173 = vmatprep.mubr.bf16.mxu0 %v364_v27 }
  0x91   : > { %1218 = vmatpush3.bf16.msra.mxu0 %v1362_v42 }
  0x92   : > { %1219 = vmatprep.subr.bf16.mxu0 %v1363_v43 }
  0x95   : > { %1220 = vmatpush3.bf16.msra.mxu0 %v1363_v43 }
  0x96   : > { %1221 = vmatprep.subr.bf16.mxu0 %v1770_v44 }
  0x97   : > { %1174 = vmatmul.mubr.bf16.gmra.mxu0 %v365_v32 }
  0x98   : > { %1177 = vmatprep.mubr.bf16.mxu0 %v366_v33 }
  0x99   : > { %1222 = vmatpush3.bf16.msra.mxu0 %v1770_v44 }
  0x9a   : > { %1223 = vmatprep.subr.bf16.mxu0 %v1365_v38 }
  0x9d   : > { %1224 = vmatpush3.bf16.msra.mxu0 %v1365_v38 }
  0x9e   : > { %1225 = vmatprep.subr.bf16.mxu0 %v1366_v39 }
  0x9f   : > { %1178 = vmatmul.mubr.bf16.gmra.mxu0 %v367_v36 }
  0xa1   : > { %1226 = vmatpush3.bf16.msra.mxu0 %v1366_v39 }
 0x147   : > { %v1167_v45 = vpop.f32.mrf.mxu0 }
 0x148   : > { %v482_v51 = vadd.f32 %v1167_v45, %v1067_v47 }
 0x149   : > { %v473_v46 = vpop.f32.mrf.mxu0 }
 0x14a   : > { %v474_v49 = vadd.f32 %v1067_v47, %v473_v46  ;;  %v538_v58 = vmax.f32 %v482_v51, 0.0 }
 0x14b   : > { %v1168_v48 = vpop.f32.mrf.mxu0 }
 0x14c   : > { %v485_v50 = vadd.f32 %v1168_v48, %v1067_v47  ;;  %v536_v56 = vmax.f32 %v474_v49, 0.0 }
 0x14d   : > { %v476_v52 = vpop.f32.mrf.mxu0 }
 0x14e   : > { %v477_v53 = vadd.f32 %v1067_v47, %v476_v52  ;;  %v539_v54 = vmax.f32 %v485_v50, 0.0 }
 0x14f   : > { %v1171_v55 = vpop.f32.mrf.mxu0 }
 0x150   : > { %v537_v57 = vmax.f32 %v477_v53, 0.0  ;;  %v553_v61 = vpack.c.bf16 %v539_v54, %v538_v58  ;;  %v498_v1 = vadd.f32 %v1171_v55, %v1067_v47 }
 0x151   : > { %v489_v59 = vpop.f32.mrf.mxu0 }
 0x152   : > { %v552_v60 = vpack.c.bf16 %v537_v57, %v536_v56  ;;  %v490_v63 = vadd.f32 %v1067_v47, %v489_v59  ;;  %v542_v8 = vmax.f32 %v498_v1, 0.0 }
 0x153   : > { %v1172_v62 = vpop.f32.mrf.mxu0 }
 0x154   : > { %v501_v0 = vadd.f32 %v1172_v62, %v1067_v47  ;;  %1197 = vmatprep.mubr.bf16.mxu1 %v552_v60  ;;  %v540_v6 = vmax.f32 %v490_v63, 0.0 }
 0x155   : > { %v492_v2 = vpop.f32.mrf.mxu0  ;;  %1198 = vmatmul.mubr.bf16.vlgmr.msra.gmra.mxu1 %v553_v61 }
 0x156   : > { %v493_v3 = vadd.f32 %v1067_v47, %v492_v2  ;;  %1253 = vmatpush3.bf16.msra.mxu1 %v1360_v40  ;;  %v543_v4 = vmax.f32 %v501_v0, 0.0  ;;  %v1367_v40 = vld [vmem:[#allocation8] sm:$0xff]  }
 0x157   : > { %v1175_v5 = vpop.f32.mrf.mxu0  ;;  %1246 = vmatprep.subr.bf16.mxu1 %v1361_v41  ;;  %1227 = vmatprep.subr.bf16.mxu0 %v1367_v40 }
 0x158   : > { %v541_v7 = vmax.f32 %v493_v3, 0.0  ;;  %v555_v11 = vpack.c.bf16 %v543_v4, %v542_v8  ;;  %v514_v15 = vadd.f32 %v1175_v5, %v1067_v47  ;;  %1228 = vmatpush3.bf16.msra.mxu0 %v1367_v40 }
 0x159   : > { %v505_v9 = vpop.f32.mrf.mxu0 }
 0x15a   : > { %v554_v10 = vpack.c.bf16 %v541_v7, %v540_v6  ;;  %1254 = vmatpush3.bf16.msra.mxu1 %v1361_v41  ;;  %v506_v13 = vadd.f32 %v1067_v47, %v505_v9  ;;  %v546_v22 = vmax.f32 %v514_v15, 0.0 }
 0x15b   : > { %v1176_v12 = vpop.f32.mrf.mxu0  ;;  %1247 = vmatprep.subr.bf16.mxu1 %v1362_v42 }
 0x15c   : > { %v517_v14 = vadd.f32 %v1176_v12, %v1067_v47  ;;  %1201 = vmatprep.mubr.bf16.mxu1 %v554_v10  ;;  %v544_v20 = vmax.f32 %v506_v13, 0.0 }
 0x15d   : > { %v508_v16 = vpop.f32.mrf.mxu0  ;;  %1202 = vmatmul.mubr.bf16.gmra.mxu1 %v555_v11 }
 0x15e   : > { %v509_v17 = vadd.f32 %v1067_v47, %v508_v16  ;;  %1255 = vmatpush3.bf16.msra.mxu1 %v1362_v42  ;;  %v547_v18 = vmax.f32 %v517_v14, 0.0 }
 0x15f   : > { %v1179_v19 = vpop.f32.mrf.mxu0  ;;  %1248 = vmatprep.subr.bf16.mxu1 %v1363_v43 }
 0x160   : > { %v545_v21 = vmax.f32 %v509_v17, 0.0  ;;  %v557_v25 = vpack.c.bf16 %v547_v18, %v546_v22  ;;  %v530_v29 = vadd.f32 %v1179_v19, %v1067_v47 }
 0x161   : > { %v521_v23 = vpop.f32.mrf.mxu0 }
 0x162   : > { %v556_v24 = vpack.c.bf16 %v545_v21, %v544_v20  ;;  %1256 = vmatpush3.bf16.msra.mxu1 %v1363_v43  ;;  %v522_v27 = vadd.f32 %v1067_v47, %v521_v23  ;;  %v550_v35 = vmax.f32 %v530_v29, 0.0  ;;  %v1076_v43 = vld [vmem:[%s1859_s4] ss:$0 sm:$0xff] }
 0x163   : > { %v1180_v26 = vpop.f32.mrf.mxu0  ;;  %1249 = vmatprep.subr.bf16.mxu1 %v1770_v44 }
 0x164   : > { %v533_v28 = vadd.f32 %v1180_v26, %v1067_v47  ;;  %1205 = vmatprep.mubr.bf16.mxu1 %v556_v24  ;;  %v548_v33 = vmax.f32 %v522_v27, 0.0 }
 0x165   : > { %v524_v30 = vpop.f32.mrf.mxu0  ;;  %1206 = vmatmul.mubr.bf16.gmra.mxu1 %v557_v25 }
 0x166   : > { %v525_v31 = vadd.f32 %v1067_v47, %v524_v30  ;;  %1257 = vmatpush3.bf16.msra.mxu1 %v1770_v44  ;;  %v551_v32 = vmax.f32 %v533_v28, 0.0 }
 0x167   : > { %1250 = vmatprep.subr.bf16.mxu1 %v1365_v38 }
 0x168   : > { %v549_v34 = vmax.f32 %v525_v31, 0.0  ;;  %v559_v37 = vpack.c.bf16 %v551_v32, %v550_v35 }
 0x16a   : > { %v558_v36 = vpack.c.bf16 %v549_v34, %v548_v33  ;;  %1258 = vmatpush3.bf16.msra.mxu1 %v1365_v38  ;;  %v1085_v34 = vld [vmem:[%s1861_s6] ss:$0 sm:$0xff] }
 0x16b   : > { %1251 = vmatprep.subr.bf16.mxu1 %v1366_v39 }
 0x16c   : > { %1209 = vmatprep.mubr.bf16.mxu1 %v558_v36 }
 0x16d   : > { %1210 = vmatmul.mubr.bf16.gmra.mxu1 %v559_v37 }
 0x16e   : > { %1259 = vmatpush3.bf16.msra.mxu1 %v1366_v39 }
 0x16f   : > { %1252 = vmatprep.subr.bf16.mxu1 %v1367_v40 }
 0x172   : > { %1260 = vmatpush3.bf16.msra.mxu1 %v1367_v40 }
 0x215   : > { %v1199_v41 = vpop.f32.mrf.mxu1 }
 0x216   : > { %v674_v47 = vadd.f32 %v1199_v41, %v1076_v43 }
 0x217   : > { %v665_v42 = vpop.f32.mrf.mxu1 }
 0x218   : > { %v666_v45 = vadd.f32 %v1076_v43, %v665_v42  ;;  %v730_v54 = vmax.f32 %v674_v47, 0.0 }
 0x219   : > { %v1200_v44 = vpop.f32.mrf.mxu1 }
 0x21a   : > { %v677_v46 = vadd.f32 %v1200_v44, %v1076_v43  ;;  %v728_v52 = vmax.f32 %v666_v45, 0.0 }
 0x21b   : > { %v668_v48 = vpop.f32.mrf.mxu1 }
 0x21c   : > { %v669_v49 = vadd.f32 %v1076_v43, %v668_v48  ;;  %v731_v50 = vmax.f32 %v677_v46, 0.0 }
 0x21d   : > { %v1203_v51 = vpop.f32.mrf.mxu1 }
 0x21e   : > { %v729_v53 = vmax.f32 %v669_v49, 0.0  ;;  %v745_v57 = vpack.c.bf16 %v731_v50, %v730_v54  ;;  %v690_v61 = vadd.f32 %v1203_v51, %v1076_v43 }
 0x21f   : > { %v681_v55 = vpop.f32.mrf.mxu1 }
 0x220   : > { %v744_v56 = vpack.c.bf16 %v729_v53, %v728_v52  ;;  %v682_v59 = vadd.f32 %v1076_v43, %v681_v55  ;;  %v734_v4 = vmax.f32 %v690_v61, 0.0 }
 0x221   : > { %v1204_v58 = vpop.f32.mrf.mxu1 }
 0x222   : > { %v693_v60 = vadd.f32 %v1204_v58, %v1076_v43  ;;  %1229 = vmatprep.mubr.bf16.mxu0 %v744_v56  ;;  %v732_v2 = vmax.f32 %v682_v59, 0.0 }
 0x223   : > { %v684_v62 = vpop.f32.mrf.mxu1  ;;  %1230 = vmatmul.mubr.bf16.vlgmr.msra.gmra.mxu0 %v745_v57 }
 0x224   : > { %v685_v63 = vadd.f32 %v1076_v43, %v684_v62  ;;  %v735_v0 = vmax.f32 %v693_v60, 0.0 }
 0x225   : > { %v1207_v1 = vpop.f32.mrf.mxu1 }
 0x226   : > { %v733_v3 = vmax.f32 %v685_v63, 0.0  ;;  %v747_v7 = vpack.c.bf16 %v735_v0, %v734_v4  ;;  %v706_v11 = vadd.f32 %v1207_v1, %v1076_v43 }
 0x227   : > { %v697_v5 = vpop.f32.mrf.mxu1 }
 0x228   : > { %v746_v6 = vpack.c.bf16 %v733_v3, %v732_v2  ;;  %v698_v9 = vadd.f32 %v1076_v43, %v697_v5  ;;  %v738_v18 = vmax.f32 %v706_v11, 0.0 }
 0x229   : > { %v1208_v8 = vpop.f32.mrf.mxu1 }
 0x22a   : > { %v709_v10 = vadd.f32 %v1208_v8, %v1076_v43  ;;  %1233 = vmatprep.mubr.bf16.mxu0 %v746_v6  ;;  %v736_v16 = vmax.f32 %v698_v9, 0.0 }
 0x22b   : > { %v700_v12 = vpop.f32.mrf.mxu1  ;;  %1234 = vmatmul.mubr.bf16.gmra.mxu0 %v747_v7 }
 0x22c   : > { %v701_v13 = vadd.f32 %v1076_v43, %v700_v12  ;;  %v739_v14 = vmax.f32 %v709_v10, 0.0 }
 0x22d   : > { %v1211_v15 = vpop.f32.mrf.mxu1 }
 0x22e   : > { %v737_v17 = vmax.f32 %v701_v13, 0.0  ;;  %v749_v21 = vpack.c.bf16 %v739_v14, %v738_v18  ;;  %v722_v25 = vadd.f32 %v1211_v15, %v1076_v43 }
 0x22f   : > { %v713_v19 = vpop.f32.mrf.mxu1 }
 0x230   : > { %v748_v20 = vpack.c.bf16 %v737_v17, %v736_v16  ;;  %v714_v23 = vadd.f32 %v1076_v43, %v713_v19  ;;  %v742_v31 = vmax.f32 %v722_v25, 0.0 }
 0x231   : > { %v1212_v22 = vpop.f32.mrf.mxu1 }
 0x232   : > { %v725_v24 = vadd.f32 %v1212_v22, %v1076_v43  ;;  %1237 = vmatprep.mubr.bf16.mxu1 %v748_v20  ;;  %v740_v29 = vmax.f32 %v714_v23, 0.0 }
 0x233   : > { %v716_v26 = vpop.f32.mrf.mxu1  ;;  %1238 = vmatmul.mubr.bf16.vlgmr.msra.gmra.mxu1 %v749_v21 }
 0x234   : > { %v717_v27 = vadd.f32 %v1076_v43, %v716_v26  ;;  %v743_v28 = vmax.f32 %v725_v24, 0.0 }
 0x236   : > { %v741_v30 = vmax.f32 %v717_v27, 0.0  ;;  %v751_v33 = vpack.c.bf16 %v743_v28, %v742_v31 }
 0x238   : > { %v750_v32 = vpack.c.bf16 %v741_v30, %v740_v29 }
 0x23a   : > { %1241 = vmatprep.mubr.bf16.mxu1 %v750_v32 }
 0x23b   : > { %1242 = vmatmul.mubr.bf16.gmra.mxu1 %v751_v33 }
 0x2e3   : > { %v1231_v35 = vpop.f32.mrf.mxu0 }
 0x2e4   : > { %v866_v36 = vadd.f32 %v1231_v35, %v1085_v34 }
 0x2e5   : > { %v857_v37 = vpop.f32.mrf.mxu0 }
 0x2e6   : > { %922 = vst [vmem:[%s1787_s21 + $0x10] sm:$0xff] %v866_v36  ;;  %v858_v38 = vadd.f32 %v1085_v34, %v857_v37 }
 0x2e7   : > { %v1232_v39 = vpop.f32.mrf.mxu0 }
 0x2e8   : > { %920 = vst [vmem:[%s1787_s21] sm:$0xff] %v858_v38  ;;  %v869_v40 = vadd.f32 %v1232_v39, %v1085_v34 }
 0x2e9   : > { %v860_v41 = vpop.f32.mrf.mxu0 }
 0x2ea   : > { %923 = vst [vmem:[%s1787_s21 + $0x18] sm:$0xff] %v869_v40  ;;  %v861_v42 = vadd.f32 %v1085_v34, %v860_v41 }
 0x2eb   : > { %v1235_v43 = vpop.f32.mrf.mxu0 }
 0x2ec   : > { %921 = vst [vmem:[%s1787_s21 + $0x8] sm:$0xff] %v861_v42  ;;  %v882_v44 = vadd.f32 %v1235_v43, %v1085_v34 }
 0x2ed   : > { %v873_v45 = vpop.f32.mrf.mxu0 }
 0x2ee   : > { %926 = vst [vmem:[%s1787_s21 + $0x30] sm:$0xff] %v882_v44  ;;  %v874_v46 = vadd.f32 %v1085_v34, %v873_v45 }
 0x2ef   : > { %v1236_v47 = vpop.f32.mrf.mxu0 }
 0x2f0   : > { %924 = vst [vmem:[%s1787_s21 + $0x20] sm:$0xff] %v874_v46  ;;  %v885_v48 = vadd.f32 %v1236_v47, %v1085_v34 }
 0x2f1   : > { %v876_v49 = vpop.f32.mrf.mxu0 }
 0x2f2   : > { %927 = vst [vmem:[%s1787_s21 + $0x38] sm:$0xff] %v885_v48  ;;  %v877_v50 = vadd.f32 %v1085_v34, %v876_v49 }
 0x2f3   : > { %v1239_v51 = vpop.f32.mrf.mxu1 }
 0x2f4   : > { %925 = vst [vmem:[%s1787_s21 + $0x28] sm:$0xff] %v877_v50  ;;  %v898_v52 = vadd.f32 %v1239_v51, %v1085_v34 }
 0x2f5   : > { %v889_v53 = vpop.f32.mrf.mxu1 }
 0x2f6   : > { %930 = vst [vmem:[%s1787_s21 + $0x50] sm:$0xff] %v898_v52  ;;  %v890_v54 = vadd.f32 %v1085_v34, %v889_v53 }
 0x2f7   : > { %v1240_v55 = vpop.f32.mrf.mxu1 }
 0x2f8   : > { %928 = vst [vmem:[%s1787_s21 + $0x40] sm:$0xff] %v890_v54  ;;  %v901_v56 = vadd.f32 %v1240_v55, %v1085_v34 }
 0x2f9   : > { %v892_v57 = vpop.f32.mrf.mxu1 }
 0x2fa   : > { %931 = vst [vmem:[%s1787_s21 + $0x58] sm:$0xff] %v901_v56  ;;  %v893_v58 = vadd.f32 %v1085_v34, %v892_v57 }
 0x2fb   : > { %v1243_v59 = vpop.f32.mrf.mxu1 }
 0x2fc   : > { %929 = vst [vmem:[%s1787_s21 + $0x48] sm:$0xff] %v893_v58  ;;  %v914_v60 = vadd.f32 %v1243_v59, %v1085_v34 }
 0x2fd   : > { %v905_v61 = vpop.f32.mrf.mxu1 }
 0x2fe   : > { %934 = vst [vmem:[%s1787_s21 + $0x70] sm:$0xff] %v914_v60  ;;  %v906_v62 = vadd.f32 %v1085_v34, %v905_v61 }
 0x2ff   : > { %v1244_v63 = vpop.f32.mrf.mxu1 }
 0x300   : > { %932 = vst [vmem:[%s1787_s21 + $0x60] sm:$0xff] %v906_v62  ;;  %v917_v0 = vadd.f32 %v1244_v63, %v1085_v34 }
 0x301   : > { %v908_v1 = vpop.f32.mrf.mxu1 }
 0x302   : > { %935 = vst [vmem:[%s1787_s21 + $0x78] sm:$0xff] %v917_v0  ;;  %v909_v2 = vadd.f32 %v1085_v34, %v908_v1 }
 0x304   : > { %933 = vst [vmem:[%s1787_s21 + $0x68] sm:$0xff] %v909_v2 }
 0x305   : > { %1487 = shalt.err (!%p1484_p9)
}
 0x306   : > { %s1488_s23 = scalar_lea.hbm %s1808_s1, 2048  ;;  %s1492_s13 = scalar_lea.hbm %s1862_s7, 4096 }
 0x307   : > { %p1489_p1 = scmp.ne.s32.totalorder %s1808_s1, %s1488_s23  ;;  %p1493_p11 = scmp.lt.s32.totalorder %s1808_s1, %s1862_s7 }
 0x308   : > { %p1494_p13 = scmp.lt.s32.totalorder %s1492_s13, %s1488_s23 }
 0x309   : > { %p1490_p8 = pnand %p1489_p1, %p1882_p6 }
 0x30a   : > { %p1495_p2 = por %p1494_p13, %p1493_p11 }
 0x30b   : > { %p1491_p10 = pneg %p1490_p8 }
 0x30d   : > { %p1496_p4 = pnand %p1495_p2, %p1491_p10 }
 0x30f   : > { %1499 = shalt.err (!%p1496_p4)
}
 0x310   : > { %s1557_s15 = smov 128   ;;  %s1558_s22 = smov 8  }
 0x311   : > { %1275 = dma.vmem_to_hbm [thread:$0]  (%p1882_p6), %s1810_s12, 2048, %s1808_s1, %s937_s18, %s1557_s15, %s1557_s15, %s1558_s22  }
 0x312 PF: > { %s965_s28 = sand.u32 1, %s1534_s24   ;;  %p1883_p12 = scmp.ne.s32.totalorder %s1869_s8, 0 }
 0x313   : > { %p1884_p0 = scmp.ge.s32.totalorder %s1546_s27, 2  ;;  %s966_s19 = scalar_lea.sflag [#allocation4], %s965_s28 }
 0x315   : > { %p1292_p5 = pnand %p1884_p0, %p1883_p12 }
 0x317   : > { %p1293_p3 = pneg %p1292_p5 }
 0x319   : > { %1529 = dma.done.wait (%p1293_p3), %s966_s19, 2048  }
 0x31a   : > { %1531 = vsyncadd (%p1293_p3), %s966_s19, 4294965248  ;;  %p22_p7 = scmp.ge.s32.totalorder %s1679_s14, 4   ;;  %s1885_s24 = smov %s1538_s25 }
 0x31b   : > { %s1886_s25 = smov %s1542_s26  ;;  %s1887_s26 = smov %s1689_s17 }
 0x31c   : > { %s1888_s27 = smov %s1679_s14  ;;  %24 = sbr.rel (!%p22_p7) target bundleno = 9 (0x9), region = 105 }
 0x321   :  { %971 = vsyncpa [#allocation3], 1 }
 0x322   :  { %973 = vsyncpa [#allocation3 + $0x1], 1 }
 0x323   :  { %974 = vsyncpa [#allocation6], 1 }
 0x324   :  { %975 = vsyncpa [#allocation9], 1 }
 0x325   :  { %976 = vsyncpa [#allocation4], 1 }
 0x326   :  { %978 = vsyncpa [#allocation4 + $0x1], 1 }

</bundles_post_ra>
